<compile_context>
chip_gen: v5e
topology: v5e:2x2
jax: 0.10.0
libtpu: 0.0.40
codegen_flags: <defaults>
</compile_context>

<pallas_src>
import functools

import jax
import jax.numpy as jnp
from jax.experimental import pallas as pl
from jax.experimental.pallas import tpu as pltpu

_SUBLANE = 8


def ner_kernel(e_ref, p_ref, w1e_ref, m_ref, b1_ref, w2_ref, b2_ref, out_ref):
    # Activation tiles are cast (in-VMEM, free-ish VPU op) to the weight dtype:
    # no-op in f32 mode, bf16 MXU operands in use_bf16 mode.  Accumulation is
    # always f32 via preferred_element_type.
    dt = w1e_ref.dtype
    # h = relu(cat(e, t) @ W1.T + b1) with t = p @ W.T folded into M = W.T @ W1t.T
    h = (jnp.dot(e_ref[...].astype(dt), w1e_ref[...],
                 preferred_element_type=jnp.float32)
         + jnp.dot(p_ref[...].astype(dt), m_ref[...],
                   preferred_element_type=jnp.float32)
         + b1_ref[...])
    h = jnp.maximum(h, 0.0)
    # out = h @ W2.T + b2
    out = (jnp.dot(h.astype(w2_ref.dtype), w2_ref[...],
                   preferred_element_type=jnp.float32)
           + b2_ref[...])
    out_ref[...] = out.astype(out_ref.dtype)


def _round_up(x, m):
    return ((x + m - 1) // m) * m


def _choose_tm(n_rows, max_tm):
    """Largest batch tile such that there are >= 4 grid steps when the batch
    allows it (>= 2 steps per TensorCore on v7x so pipelining hides the DMA
    prologue/epilogue), capped at max_tm.  Single-TC v5e/v6e just pay a few
    ~0.35us extra steps, which is negligible at these tile sizes."""
    quarter = _round_up(pl.cdiv(n_rows, 4), _SUBLANE)
    return max(_SUBLANE, min(max_tm, quarter))


def ner_reference(e, p, W, W1, b1, W2, b2):
    t = p @ W.T
    v = jnp.concatenate([e, t], axis=1)
    h = jnp.maximum(v @ W1.T + b1, 0.0)
    return h @ W2.T + b2


def _ner_pallas(e, p, W, W1, b1, W2, b2, *, max_tm, use_bf16, out_dtype):
    N, input_size = e.shape
    inputW_size, outputW_size = W.shape
    hidden_size = W1.shape[0]
    output_size = W2.shape[0]

    # Weight dtype: bf16 halves the (once-DMA'd) weight bytes and selects the
    # bf16 MXU path; activations are only cast inside the kernel (no extra HBM
    # pass).  Valid on v5e/v6e/v7x.
    w_dtype = jnp.bfloat16 if use_bf16 else jnp.float32

    # Glue: pre-transpose / split / fold weights so the kernel is pure
    # (row,in)@(in,out).  The W -> fc1 fold is done once, in f32.
    W1e_t = W1[:, :input_size].T                     # (input,  hidden)
    W1t_t = W1[:, input_size:].T                     # (inputW, hidden)
    M = (W.T.astype(jnp.float32) @ W1t_t.astype(jnp.float32))   # (outputW, hidden)
    W1e_t = W1e_t.astype(w_dtype)
    M = M.astype(w_dtype)
    W2t = W2.T.astype(w_dtype)                       # (hidden, output)
    b1_2d = b1.reshape(1, hidden_size).astype(jnp.float32)
    b2_2d = b2.reshape(1, output_size).astype(jnp.float32)

    # NOTE: e/p are passed through in their incoming dtype -- no standalone
    # wrapper cast (a separate XLA cast would add a full extra HBM pass).
    e_in = e
    p_in = p

    # Tile selection + wrapper-side padding for ragged batches.
    tm = _choose_tm(N, max_tm)
    n_pad = _round_up(N, tm)
    if n_pad != N:
        e_in = jnp.pad(e_in, ((0, n_pad - N), (0, 0)))
        p_in = jnp.pad(p_in, ((0, n_pad - N), (0, 0)))
    grid = (n_pad // tm,)

    flops = 2 * n_pad * ((input_size + outputW_size) * hidden_size
                         + hidden_size * output_size)
    bytes_accessed = (e_in.size * e_in.dtype.itemsize
                      + p_in.size * p_in.dtype.itemsize
                      + W1e_t.size * W1e_t.dtype.itemsize
                      + M.size * M.dtype.itemsize
                      + W2t.size * W2t.dtype.itemsize
                      + b1_2d.size * 4 + b2_2d.size * 4
                      + n_pad * output_size * jnp.dtype(out_dtype).itemsize)

    out = pl.pallas_call(
        ner_kernel,
        out_shape=jax.ShapeDtypeStruct((n_pad, output_size), out_dtype),
        grid_spec=pltpu.PrefetchScalarGridSpec(
            num_scalar_prefetch=0,
            grid=grid,
            in_specs=[
                pl.BlockSpec((tm, input_size), lambda i: (i, 0)),        # e
                pl.BlockSpec((tm, outputW_size), lambda i: (i, 0)),      # p
                # Weights/biases: constant index_map -> DMA'd once, resident.
                pl.BlockSpec((input_size, hidden_size), lambda i: (0, 0)),    # W1e.T
                pl.BlockSpec((outputW_size, hidden_size), lambda i: (0, 0)),  # M
                pl.BlockSpec((1, hidden_size), lambda i: (0, 0)),             # b1
                pl.BlockSpec((hidden_size, output_size), lambda i: (0, 0)),   # W2.T
                pl.BlockSpec((1, output_size), lambda i: (0, 0)),             # b2
            ],
            out_specs=pl.BlockSpec((tm, output_size), lambda i: (i, 0)),
        ),
        compiler_params=pltpu.CompilerParams(
            dimension_semantics=("parallel",)),
        cost_estimate=pl.CostEstimate(
            flops=flops, transcendentals=0, bytes_accessed=bytes_accessed),
    )(e_in, p_in, W1e_t, M, b1_2d, W2t, b2_2d)

    return out[:N] if n_pad != N else out


@functools.partial(
    jax.jit,
    static_argnames=("max_tm", "min_pallas_batch", "use_bf16", "out_dtype"))
def ner_forward(e, p, W, W1, b1, W2, b2, *,
                max_tm=4096, min_pallas_batch=128, use_bf16=False,
                out_dtype=None):
    """e: (N, input_size), p: (N, outputW_size). Returns (N, output_size)."""
    if out_dtype is None:
        out_dtype = e.dtype
    if e.shape[0] < min_pallas_batch:
        # Kernel launch + pipeline prime would exceed the whole computation for
        # tiny batches; let XLA fuse the small matmuls instead.
        return ner_reference(e, p, W, W1, b1, W2, b2).astype(out_dtype)
    return _ner_pallas(e, p, W, W1, b1, W2, b2,
                       max_tm=max_tm, use_bf16=use_bf16, out_dtype=out_dtype)


if __name__ == "__main__":
    # Small shapes consistent with the module.
    input_size = 32
    hidden_size = 64
    output_size = 16
    inputW_size = 16
    outputW_size = 24

    key = jax.random.PRNGKey(0)
    ke, kp, kw, kw1, kb1, kw2, kb2 = jax.random.split(key, 7)

    # Batch large enough to take the Pallas path and ragged so the wrapper
    # padding is exercised: 500 rows -> tm=128, padded to 512, grid=(4,).
    N = 500
    e = jax.random.normal(ke, (N, input_size), dtype=jnp.float32)
    p = jax.random.normal(kp, (N, outputW_size), dtype=jnp.float32)

    # Deterministic parameter init (synthetic, not a checkpoint load).
    W = jax.random.uniform(kw, (inputW_size, outputW_size), dtype=jnp.float32)
    W1 = jax.random.normal(kw1, (hidden_size, input_size + inputW_size),
                           dtype=jnp.float32) * 0.1
    b1 = jax.random.normal(kb1, (hidden_size,), dtype=jnp.float32) * 0.1
    W2 = jax.random.normal(kw2, (output_size, hidden_size),
                           dtype=jnp.float32) * 0.1
    b2 = jax.random.normal(kb2, (output_size,), dtype=jnp.float32) * 0.1

    ref = ner_reference(e, p, W, W1, b1, W2, b2)

    # 1) f32 Pallas kernel path (exact semantics, W folded into fc1).
    out = jax.block_until_ready(ner_forward(e, p, W, W1, b1, W2, b2))
    assert out.shape == (N, output_size)
    assert jnp.allclose(out, ref, atol=1e-4, rtol=1e-4)

    # 2) bf16 weight/MXU path (valid on v5e/v6e/v7x; f32 accumulation).
    out_bf16 = jax.block_until_ready(
        ner_forward(e, p, W, W1, b1, W2, b2, use_bf16=True))
    assert out_bf16.shape == (N, output_size)
    assert jnp.allclose(out_bf16, ref, atol=2e-1, rtol=1e-1)

    # 3) Caller-supplied bf16 activations (full DMA-byte halving), f32 output.
    out_bf16_act = jax.block_until_ready(
        ner_forward(e.astype(jnp.bfloat16), p.astype(jnp.bfloat16),
                    W, W1, b1, W2, b2, use_bf16=True,
                    out_dtype=jnp.float32))
    assert out_bf16_act.shape == (N, output_size)
    assert jnp.allclose(out_bf16_act, ref, atol=3e-1, rtol=1e-1)

    # 4) Tiny batch dispatches to the fused pure-JAX path.
    out_small = jax.block_until_ready(
        ner_forward(e[:16], p[:16], W, W1, b1, W2, b2))
    assert jnp.allclose(out_small, ref[:16], atol=1e-4, rtol=1e-4)

    print("KERNEL_OK")
</pallas_src>

<mosaic_0001>
module attributes {stable_mosaic.version = 11 : i64} {
  func.func @ner_kernel(%arg0: i32, %arg1: memref<128x32xf32, #tpu.memory_space<vmem>>, %arg2: memref<128x24xf32, #tpu.memory_space<vmem>>, %arg3: memref<32x64xf32, #tpu.memory_space<vmem>>, %arg4: memref<24x64xf32, #tpu.memory_space<vmem>>, %arg5: memref<1x64xf32, #tpu.memory_space<vmem>>, %arg6: memref<64x16xf32, #tpu.memory_space<vmem>>, %arg7: memref<1x16xf32, #tpu.memory_space<vmem>>, %arg8: memref<128x16xf32, #tpu.memory_space<vmem>>) attributes {dimension_semantics = [#tpu.dimension_semantics<parallel>], iteration_bounds = array<i64: 4>, scalar_prefetch = 0 : i64, scratch_operands = 0 : i64, tpu.core_type = #tpu.core_type<tc>, window_params = [{transform_indices = @transform_0, window_bounds = array<i64: 128, 32>}, {transform_indices = @transform_1, window_bounds = array<i64: 128, 24>}, {pipeline_mode = #tpu.pipeline_mode<synchronous>, transform_indices = @transform_2, window_bounds = array<i64: 32, 64>}, {pipeline_mode = #tpu.pipeline_mode<synchronous>, transform_indices = @transform_3, window_bounds = array<i64: 24, 64>}, {pipeline_mode = #tpu.pipeline_mode<synchronous>, transform_indices = @transform_4, window_bounds = array<i64: 1, 64>}, {pipeline_mode = #tpu.pipeline_mode<synchronous>, transform_indices = @transform_5, window_bounds = array<i64: 64, 16>}, {pipeline_mode = #tpu.pipeline_mode<synchronous>, transform_indices = @transform_6, window_bounds = array<i64: 1, 16>}, {transform_indices = @transform_7, window_bounds = array<i64: 128, 16>}]} {
    %c0 = arith.constant 0 : index
    %c0_0 = arith.constant 0 : index
    %0 = vector.load %arg1[%c0, %c0_0] : memref<128x32xf32, #tpu.memory_space<vmem>>, vector<128x32xf32>
    %c0_1 = arith.constant 0 : index
    %c0_2 = arith.constant 0 : index
    %1 = vector.load %arg3[%c0_1, %c0_2] : memref<32x64xf32, #tpu.memory_space<vmem>>, vector<32x64xf32>
    %cst = arith.constant dense<0.000000e+00> : vector<128x64xf32>
    %2 = tpu.matmul %0, %1, %cst {dimension_numbers = #tpu.dot_dimension_numbers<[1], [0], [0], [1], [0, 0, 1, 1], [], []>} : vector<128x32xf32>, vector<32x64xf32>, vector<128x64xf32> -> vector<128x64xf32>
    %c0_3 = arith.constant 0 : index
    %c0_4 = arith.constant 0 : index
    %3 = vector.load %arg2[%c0_3, %c0_4] : memref<128x24xf32, #tpu.memory_space<vmem>>, vector<128x24xf32>
    %c0_5 = arith.constant 0 : index
    %c0_6 = arith.constant 0 : index
    %4 = vector.load %arg4[%c0_5, %c0_6] : memref<24x64xf32, #tpu.memory_space<vmem>>, vector<24x64xf32>
    %cst_7 = arith.constant dense<0.000000e+00> : vector<128x64xf32>
    %5 = tpu.matmul %3, %4, %cst_7 {dimension_numbers = #tpu.dot_dimension_numbers<[1], [0], [0], [1], [0, 0, 1, 1], [], []>} : vector<128x24xf32>, vector<24x64xf32>, vector<128x64xf32> -> vector<128x64xf32>
    %6 = arith.addf %2, %5 : vector<128x64xf32>
    %c0_8 = arith.constant 0 : index
    %c0_9 = arith.constant 0 : index
    %7 = vector.load %arg5[%c0_8, %c0_9] : memref<1x64xf32, #tpu.memory_space<vmem>>, vector<1x64xf32>
    %8 = vector.broadcast %7 : vector<1x64xf32> to vector<128x64xf32>
    %9 = arith.addf %6, %8 : vector<128x64xf32>
    %cst_10 = arith.constant 0.000000e+00 : f32
    %10 = vector.broadcast %cst_10 : f32 to vector<128x64xf32>
    %11 = arith.maximumf %9, %10 : vector<128x64xf32>
    %c0_11 = arith.constant 0 : index
    %c0_12 = arith.constant 0 : index
    %12 = vector.load %arg6[%c0_11, %c0_12] : memref<64x16xf32, #tpu.memory_space<vmem>>, vector<64x16xf32>
    %cst_13 = arith.constant dense<0.000000e+00> : vector<128x16xf32>
    %13 = tpu.matmul %11, %12, %cst_13 {dimension_numbers = #tpu.dot_dimension_numbers<[1], [0], [0], [1], [0, 0, 1, 1], [], []>} : vector<128x64xf32>, vector<64x16xf32>, vector<128x16xf32> -> vector<128x16xf32>
    %c0_14 = arith.constant 0 : index
    %c0_15 = arith.constant 0 : index
    %14 = vector.load %arg7[%c0_14, %c0_15] : memref<1x16xf32, #tpu.memory_space<vmem>>, vector<1x16xf32>
    %15 = vector.broadcast %14 : vector<1x16xf32> to vector<128x16xf32>
    %16 = arith.addf %13, %15 : vector<128x16xf32>
    %c0_16 = arith.constant 0 : index
    %c0_17 = arith.constant 0 : index
    %17 = vector.load %arg8[%c0_16, %c0_17] : memref<128x16xf32, #tpu.memory_space<vmem>>, vector<128x16xf32>
    tpu.vector_store %arg8[%c0_16, %c0_17], %16 {strides = array<i32>} : memref<128x16xf32, #tpu.memory_space<vmem>>, vector<128x16xf32>,
    return
  }
  func.func @transform_0(%arg0: i32) -> (i32, i32) {
    %c0_i32 = arith.constant 0 : i32
    %c0_i32_0 = arith.constant 0 : i32
    return %arg0, %c0_i32 : i32, i32
  }
  func.func @transform_1(%arg0: i32) -> (i32, i32) {
    %c0_i32 = arith.constant 0 : i32
    %c0_i32_0 = arith.constant 0 : i32
    return %arg0, %c0_i32 : i32, i32
  }
  func.func @transform_2(%arg0: i32) -> (i32, i32) {
    %c0_i32 = arith.constant 0 : i32
    %c0_i32_0 = arith.constant 0 : i32
    %c0_i32_1 = arith.constant 0 : i32
    return %c0_i32, %c0_i32_0 : i32, i32
  }
  func.func @transform_3(%arg0: i32) -> (i32, i32) {
    %c0_i32 = arith.constant 0 : i32
    %c0_i32_0 = arith.constant 0 : i32
    %c0_i32_1 = arith.constant 0 : i32
    return %c0_i32, %c0_i32_0 : i32, i32
  }
  func.func @transform_4(%arg0: i32) -> (i32, i32) {
    %c0_i32 = arith.constant 0 : i32
    %c0_i32_0 = arith.constant 0 : i32
    %c0_i32_1 = arith.constant 0 : i32
    return %c0_i32, %c0_i32_0 : i32, i32
  }
  func.func @transform_5(%arg0: i32) -> (i32, i32) {
    %c0_i32 = arith.constant 0 : i32
    %c0_i32_0 = arith.constant 0 : i32
    %c0_i32_1 = arith.constant 0 : i32
    return %c0_i32, %c0_i32_0 : i32, i32
  }
  func.func @transform_6(%arg0: i32) -> (i32, i32) {
    %c0_i32 = arith.constant 0 : i32
    %c0_i32_0 = arith.constant 0 : i32
    %c0_i32_1 = arith.constant 0 : i32
    return %c0_i32, %c0_i32_0 : i32, i32
  }
  func.func @transform_7(%arg0: i32) -> (i32, i32) {
    %c0_i32 = arith.constant 0 : i32
    %c0_i32_0 = arith.constant 0 : i32
    return %arg0, %c0_i32 : i32, i32
  }
}

</mosaic_0001>

<bundles_post_ra>
// kernel: ner_forward.1
= control target key start
LH: loop header
LB: loop body
LE: loop exit
PB: predicated region body
PF: predicated region fallthrough
CT: control target
= control target key end

     0   :  { %s952_s24 = smov 0   ;;  %s1164_s0 = inlined_call_operand.vmem [shape: f32[512,32], index: 0, kind: input, shape index: {}]   ;;  %s1165_s1 = inlined_call_operand.vmem [shape: f32[512,24], index: 1, kind: input, shape index: {}]   ;;  %s1166_s2 = inlined_call_operand.vmem [shape: f32[32,64], index: 2, kind: input, shape index: {}]   ;;  %s1167_s3 = inlined_call_operand.vmem [shape: f32[24,64], index: 3, kind: input, shape index: {}]   ;;  %s1168_s4 = inlined_call_operand.vmem [shape: f32[1,64], index: 4, kind: input, shape index: {}]   ;;  %s1169_s5 = inlined_call_operand.vmem [shape: f32[64,16], index: 5, kind: input, shape index: {}]   ;;  %s1170_s6 = inlined_call_operand.vmem [shape: f32[1,16], index: 6, kind: input, shape index: {}]   ;;  %s1171_s7 = inlined_call_operand.vmem [shape: f32[512,16], index: 7, kind: output, shape index: {}]  }
   0x1 LB: > { %s818_s25 = sadd.s32 4294967295, %s910_s24   ;;  %p822_p0 = scmp.ge.s32.totalorder %s910_s24, 1  ;;  %s910_s24 = sphi %s952_s24, %s17_s24  }
   0x2   : > { %p249_p1 = scmp.lt.s32.totalorder %s910_s24, 5 }
   0x4   : > { %p250_p2 = pnand %p822_p0, %p249_p1 }
   0x5   : > { %s823_s9 = sshll.u32 (!%p250_p2), %s818_s25, 4 }
   0x6   : > { %253 = sbr.rel (%p250_p2) target bundleno = 406 (0x196), region = 48  ;;  %p287_p3 = scmp.lt.s32.totalorder (!%p250_p2), %s823_s9, 63 }
   0xb   : > { %v323_v0 = vld [vmem:[%s1166_s2 + $0x18] sm:$0xff]  ;;  %v342_v1 = vld [vmem:[%s1167_s3 + $0x10] sm:$0xff]  ;;  %v341_v3 = vld [vmem:[%s1167_s3 + $0x8] sm:$0xff]  ;;  %s1173_s9 = smov (!%p287_p3, %s823_s9), 63  ;;  %vm343_vm0 = vcmask 195584   ;;  %vm457_vm1 = vcmask 261120  }
   0xc   : > { %v322_v2 = vld [vmem:[%s1166_s2 + $0x10] sm:$0xff]  ;;  %518 = vmatpush.msra.mxu1 %v323_v0  ;;  %405 = vmatpush.msra.mxu0 %v342_v1  ;;  %v321_v4 = vld [vmem:[%s1166_s2 + $0x8] sm:$0xff]  ;;  %v340_v5 = vld [vmem:[%s1167_s3] sm:$0xff]  ;;  %s981_s18 = sshll.u32 %s1173_s9, 3  ;;  %vm619_vm2 = vcmask 523264   ;;  %vm733_vm3 = vcmask 130048  }
   0xd   : > { %879 = vmatpush.msra.mxu3 %v342_v1  ;;  %v320_v6 = vld [vmem:[%s1166_s2] sm:$0xff]  ;;  %s987_s21 = scalar_lea.vmem %s1165_s1, %s981_s18  ;;  %s993_s25 = scalar_lea.vmem %s1164_s0, %s981_s18  ;;  %v614_v31 = vld [vmem:[%s1169_s5 + $0x38] sm:$0xff]  ;;  %v613_v32 = vld [vmem:[%s1169_s5 + $0x30] sm:$0xff] }
   0xe   : > { %519 = vmatpush.msra.mxu1 %v322_v2  ;;  %406 = vmatpush.msra.mxu0 %v341_v3  ;;  %v324_v7 = vld [vmem:[%s987_s21] sm:$0xff]  ;;  %v325_v9 = vld [vmem:[%s987_s21 + $0x8] sm:$0xff]  ;;  %v326_v11 = vld [vmem:[%s987_s21 + $0x10] sm:$0xff]  ;;  %s1127_s27 = scalar_lea.vmem %s1171_s7, %s981_s18 }
   0xf   : > { %880 = vmatpush.msra.mxu3 %v341_v3  ;;  %v304_v8 = vld [vmem:[%s993_s25] sm:$0xff]  ;;  %v305_v10 = vld [vmem:[%s993_s25 + $0x8] sm:$0xff]  ;;  %v306_v12 = vld [vmem:[%s993_s25 + $0x10] sm:$0xff]  ;;  %676 = vmatpush.msra.mxu2 %v614_v31 }
  0x10   : > { %520 = vmatpush.msra.mxu1 %v321_v4  ;;  %407 = vmatpush.msra.mxu0 %v340_v5  ;;  %v337_v13 = vld [vmem:[%s987_s21 + $0x68] sm:$0xff]  ;;  %v327_v14 = vld [vmem:[%s987_s21 + $0x18] sm:$0xff]  ;;  %v338_v16 = vld [vmem:[%s987_s21 + $0x70] sm:$0xff] }
  0x11   : > { %881 = vmatpush.msra.mxu3 %v340_v5  ;;  %829 = vmatmul.msk.f32.vlgmr.msra.gmra.mxu0 %vm343_vm0, %v324_v7  ;;  %v307_v15 = vld [vmem:[%s993_s25 + $0x18] sm:$0xff]  ;;  %v328_v17 = vld [vmem:[%s987_s21 + $0x20] sm:$0xff]  ;;  %v329_v20 = vld [vmem:[%s987_s21 + $0x28] sm:$0xff] }
  0x12   : > { %521 = vmatpush.msra.mxu1 %v320_v6  ;;  %842 = vmatmul.msk.f32.vlgmr.msra.gmra.mxu3 %vm343_vm0, %v337_v13  ;;  %v308_v18 = vld [vmem:[%s993_s25 + $0x20] sm:$0xff]  ;;  %v339_v19 = vld [vmem:[%s987_s21 + $0x78] sm:$0xff]  ;;  %v309_v21 = vld [vmem:[%s993_s25 + $0x28] sm:$0xff] }
  0x13   : > { %882 = vmatpush.msrb.mxu3 %v323_v0  ;;  %845 = vmatmul.msk.f32.vlgmr.msra.gmra.mxu1 %vm457_vm1, %v304_v8  ;;  %v317_v22 = vld [vmem:[%s993_s25 + $0x68] sm:$0xff]  ;;  %v330_v23 = vld [vmem:[%s987_s21 + $0x30] sm:$0xff]  ;;  %v331_v26 = vld [vmem:[%s987_s21 + $0x38] sm:$0xff] }
  0x14   : > { %v310_v24 = vld [vmem:[%s993_s25 + $0x30] sm:$0xff]  ;;  %v311_v27 = vld [vmem:[%s993_s25 + $0x38] sm:$0xff]  ;;  %v332_v29 = vld [vmem:[%s987_s21 + $0x40] sm:$0xff]  ;;  %677 = vmatpush.msra.mxu2 %v613_v32 }
  0x15   : > { %883 = vmatpush.msrb.mxu3 %v322_v2  ;;  %v318_v25 = vld [vmem:[%s993_s25 + $0x70] sm:$0xff]  ;;  %v319_v28 = vld [vmem:[%s993_s25 + $0x78] sm:$0xff]  ;;  %v312_v30 = vld [vmem:[%s993_s25 + $0x40] sm:$0xff] }
  0x16   : > { %v612_v33 = vld [vmem:[%s1169_s5 + $0x28] sm:$0xff]  ;;  %v611_v34 = vld [vmem:[%s1169_s5 + $0x20] sm:$0xff]  ;;  %v334_v37 = vld [vmem:[%s987_s21 + $0x50] sm:$0xff] }
  0x17   : > { %884 = vmatpush.msrb.mxu3 %v321_v4  ;;  %v333_v35 = vld [vmem:[%s987_s21 + $0x48] sm:$0xff]  ;;  %678 = vmatpush.msra.mxu2 %v612_v33  ;;  %v314_v38 = vld [vmem:[%s993_s25 + $0x50] sm:$0xff]  ;;  %v335_v39 = vld [vmem:[%s987_s21 + $0x58] sm:$0xff] }
  0x18   : > { %v313_v36 = vld [vmem:[%s993_s25 + $0x48] sm:$0xff]  ;;  %v315_v40 = vld [vmem:[%s993_s25 + $0x58] sm:$0xff]  ;;  %v336_v42 = vld [vmem:[%s987_s21 + $0x60] sm:$0xff] }
  0x19   : > { %885 = vmatpush.msrb.mxu3 %v320_v6  ;;  %830 = vmatmul.msk.f32.gmra.mxu0 %vm343_vm0, %v325_v9  ;;  %v610_v41 = vld [vmem:[%s1169_s5 + $0x18] sm:$0xff]  ;;  %v316_v43 = vld [vmem:[%s993_s25 + $0x60] sm:$0xff]  ;;  %v609_v44 = vld [vmem:[%s1169_s5 + $0x10] sm:$0xff] }
  0x1a   : > { %843 = vmatmul.msk.f32.gmra.mxu3 %vm343_vm0, %v338_v16  ;;  %679 = vmatpush.msra.mxu2 %v611_v34  ;;  %v608_v45 = vld [vmem:[%s1169_s5 + $0x8] sm:$0xff]  ;;  %v607_v46 = vld [vmem:[%s1169_s5] sm:$0xff] }
  0x1b   : > { %846 = vmatmul.msk.f32.gmra.mxu1 %vm457_vm1, %v305_v10  ;;  %886 = vmatpush.msra.mxu3 %v614_v31  ;;  %v1086_v47 = vld [vmem:[%s1168_s4] ss:$0 sm:$0xff] }
  0x1c   : > { %680 = vmatpush.msra.mxu2 %v610_v41 }
  0x1d   : > { %887 = vmatpush.msra.mxu3 %v613_v32 }
  0x1e   : > { %681 = vmatpush.msra.mxu2 %v609_v44 }
  0x1f   : > { %888 = vmatpush.msra.mxu3 %v612_v33 }
  0x20   : > { %682 = vmatpush.msra.mxu2 %v608_v45 }
  0x21   : > { %831 = vmatmul.msk.f32.gmra.mxu0 %vm343_vm0, %v326_v11  ;;  %889 = vmatpush.msra.mxu3 %v611_v34 }
  0x22   : > { %844 = vmatmul.msk.f32.gmra.mxu3 %vm343_vm0, %v339_v19  ;;  %683 = vmatpush.msra.mxu2 %v607_v46 }
  0x23   : > { %847 = vmatmul.msk.f32.gmra.mxu1 %vm457_vm1, %v306_v12  ;;  %890 = vmatpush.msra.mxu3 %v610_v41 }
  0x25   : > { %891 = vmatpush.msra.mxu3 %v609_v44 }
  0x27   : > { %892 = vmatpush.msra.mxu3 %v608_v45 }
  0x29   : > { %832 = vmatmul.msk.f32.gmra.mxu0 %vm343_vm0, %v327_v14  ;;  %893 = vmatpush.msra.mxu3 %v607_v46 }
  0x2a   : > { %858 = vmatmul.msk.f32.vlgmr.msrb.gmra.mxu3 %vm457_vm1, %v317_v22 }
  0x2b   : > { %848 = vmatmul.msk.f32.gmra.mxu1 %vm457_vm1, %v307_v15 }
  0x31   : > { %833 = vmatmul.msk.f32.gmra.mxu0 %vm343_vm0, %v328_v17 }
  0x32   : > { %859 = vmatmul.msk.f32.gmra.mxu3 %vm457_vm1, %v318_v25 }
  0x33   : > { %849 = vmatmul.msk.f32.gmra.mxu1 %vm457_vm1, %v308_v18 }
  0x39   : > { %834 = vmatmul.msk.f32.gmra.mxu0 %vm343_vm0, %v329_v20 }
  0x3a   : > { %860 = vmatmul.msk.f32.gmra.mxu3 %vm457_vm1, %v319_v28 }
  0x3b   : > { %850 = vmatmul.msk.f32.gmra.mxu1 %vm457_vm1, %v309_v21 }
  0x41   : > { %835 = vmatmul.msk.f32.gmra.mxu0 %vm343_vm0, %v330_v23 }
  0x43   : > { %851 = vmatmul.msk.f32.gmra.mxu1 %vm457_vm1, %v310_v24 }
  0x49   : > { %836 = vmatmul.msk.f32.gmra.mxu0 %vm343_vm0, %v331_v26 }
  0x4b   : > { %852 = vmatmul.msk.f32.gmra.mxu1 %vm457_vm1, %v311_v27 }
  0x51   : > { %837 = vmatmul.msk.f32.gmra.mxu0 %vm343_vm0, %v332_v29 }
  0x53   : > { %853 = vmatmul.msk.f32.gmra.mxu1 %vm457_vm1, %v312_v30 }
  0x59   : > { %838 = vmatmul.msk.f32.gmra.mxu0 %vm343_vm0, %v333_v35 }
  0x5b   : > { %854 = vmatmul.msk.f32.gmra.mxu1 %vm457_vm1, %v313_v36 }
  0x61   : > { %839 = vmatmul.msk.f32.gmra.mxu0 %vm343_vm0, %v334_v37 }
  0x63   : > { %855 = vmatmul.msk.f32.gmra.mxu1 %vm457_vm1, %v314_v38 }
  0x69   : > { %840 = vmatmul.msk.f32.gmra.mxu0 %vm343_vm0, %v335_v39 }
  0x6b   : > { %856 = vmatmul.msk.f32.gmra.mxu1 %vm457_vm1, %v315_v40 }
  0x71   : > { %841 = vmatmul.msk.f32.gmra.mxu0 %vm343_vm0, %v336_v42 }
  0x73   : > { %857 = vmatmul.msk.f32.gmra.mxu1 %vm457_vm1, %v316_v43 }
  0x8e   : > { %v409_v48 = vpop.f32.mrf.mxu0 }
  0x90   : > { %v523_v49 = vpop.f32.mrf.mxu1 }
  0x91   : > { %v524_v50 = vadd.f32 %v523_v49, %v409_v48 }
  0x93   : > { %v575_v51 = vadd.f32 %v1086_v47, %v524_v50 }
  0x95   : > { %v591_v52 = vmax.f32 %v575_v51, 0.0  ;;  %v448_v24 = vpop.f32.mrf.mxu3 }
  0x96   : > { %v412_v53 = vpop.f32.mrf.mxu0 }
  0x97   : > { %861 = vmatmul.msk.f32.vlgmr.msra.gmra.mxu2 %vm619_vm2, %v591_v52 }
  0x98   : > { %v526_v54 = vpop.f32.mrf.mxu1 }
  0x99   : > { %v527_v55 = vadd.f32 %v526_v54, %v412_v53 }
  0x9b   : > { %v576_v56 = vadd.f32 %v1086_v47, %v527_v55 }
  0x9d   : > { %v592_v57 = vmax.f32 %v576_v56, 0.0  ;;  %v451_v33 = vpop.f32.mrf.mxu3 }
  0x9e   : > { %v415_v58 = vpop.f32.mrf.mxu0 }
  0x9f   : > { %862 = vmatmul.msk.f32.gmra.mxu2 %vm619_vm2, %v592_v57 }
  0xa0   : > { %v529_v59 = vpop.f32.mrf.mxu1 }
  0xa1   : > { %v530_v60 = vadd.f32 %v529_v59, %v415_v58 }
  0xa3   : > { %v577_v61 = vadd.f32 %v1086_v47, %v530_v60 }
  0xa5   : > { %v593_v62 = vmax.f32 %v577_v61, 0.0  ;;  %v454_v40 = vpop.f32.mrf.mxu3 }
  0xa6   : > { %v418_v63 = vpop.f32.mrf.mxu0 }
  0xa7   : > { %863 = vmatmul.msk.f32.gmra.mxu2 %vm619_vm2, %v593_v62 }
  0xa8   : > { %v532_v0 = vpop.f32.mrf.mxu1 }
  0xa9   : > { %v533_v1 = vadd.f32 %v532_v0, %v418_v63 }
  0xab   : > { %v578_v2 = vadd.f32 %v1086_v47, %v533_v1  ;;  %v903_v1 = vld [vmem:[%s1170_s6] ss:$0 sm:$0xff] }
  0xad   : > { %v594_v3 = vmax.f32 %v578_v2, 0.0  ;;  %v562_v48 = vpop.f32.mrf.mxu3 }
  0xae   : > { %v421_v4 = vpop.f32.mrf.mxu0  ;;  %v563_v53 = vadd.f32 %v562_v48, %v448_v24 }
  0xaf   : > { %864 = vmatmul.msk.f32.gmra.mxu2 %vm619_vm2, %v594_v3 }
  0xb0   : > { %v535_v5 = vpop.f32.mrf.mxu1  ;;  %v588_v56 = vadd.f32 %v1086_v47, %v563_v53 }
  0xb1   : > { %v536_v6 = vadd.f32 %v535_v5, %v421_v4 }
  0xb2   : > { %v604_v57 = vmax.f32 %v588_v56, 0.0 }
  0xb3   : > { %v579_v7 = vadd.f32 %v1086_v47, %v536_v6 }
  0xb5   : > { %v595_v8 = vmax.f32 %v579_v7, 0.0  ;;  %v565_v55 = vpop.f32.mrf.mxu3 }
  0xb6   : > { %v424_v9 = vpop.f32.mrf.mxu0  ;;  %v566_v58 = vadd.f32 %v565_v55, %v451_v33 }
  0xb7   : > { %865 = vmatmul.msk.f32.gmra.mxu2 %vm619_vm2, %v595_v8 }
  0xb8   : > { %v538_v10 = vpop.f32.mrf.mxu1  ;;  %v589_v59 = vadd.f32 %v1086_v47, %v566_v58 }
  0xb9   : > { %v539_v11 = vadd.f32 %v538_v10, %v424_v9 }
  0xba   : > { %v605_v61 = vmax.f32 %v589_v59, 0.0 }
  0xbb   : > { %v580_v12 = vadd.f32 %v1086_v47, %v539_v11 }
  0xbd   : > { %v596_v13 = vmax.f32 %v580_v12, 0.0  ;;  %v568_v60 = vpop.f32.mrf.mxu3 }
  0xbe   : > { %v427_v14 = vpop.f32.mrf.mxu0  ;;  %v569_v62 = vadd.f32 %v568_v60, %v454_v40 }
  0xbf   : > { %866 = vmatmul.msk.f32.gmra.mxu2 %vm619_vm2, %v596_v13 }
  0xc0   : > { %v541_v15 = vpop.f32.mrf.mxu1  ;;  %v590_v63 = vadd.f32 %v1086_v47, %v569_v62 }
  0xc1   : > { %v542_v16 = vadd.f32 %v541_v15, %v427_v14 }
  0xc2   : > { %v606_v0 = vmax.f32 %v590_v63, 0.0 }
  0xc3   : > { %v581_v17 = vadd.f32 %v1086_v47, %v542_v16 }
  0xc5   : > { %v597_v18 = vmax.f32 %v581_v17, 0.0 }
  0xc6   : > { %v430_v19 = vpop.f32.mrf.mxu0 }
  0xc7   : > { %867 = vmatmul.msk.f32.gmra.mxu2 %vm619_vm2, %v597_v18 }
  0xc8   : > { %v544_v20 = vpop.f32.mrf.mxu1 }
  0xc9   : > { %v545_v21 = vadd.f32 %v544_v20, %v430_v19 }
  0xcb   : > { %v582_v22 = vadd.f32 %v1086_v47, %v545_v21 }
  0xcd   : > { %v598_v23 = vmax.f32 %v582_v22, 0.0 }
  0xce   : > { %v433_v25 = vpop.f32.mrf.mxu0 }
  0xcf   : > { %868 = vmatmul.msk.f32.gmra.mxu2 %vm619_vm2, %v598_v23 }
  0xd0   : > { %v547_v26 = vpop.f32.mrf.mxu1 }
  0xd1   : > { %v548_v27 = vadd.f32 %v547_v26, %v433_v25 }
  0xd3   : > { %v583_v28 = vadd.f32 %v1086_v47, %v548_v27 }
  0xd5   : > { %v599_v29 = vmax.f32 %v583_v28, 0.0 }
  0xd6   : > { %v436_v30 = vpop.f32.mrf.mxu0 }
  0xd7   : > { %869 = vmatmul.msk.f32.gmra.mxu2 %vm619_vm2, %v599_v29 }
  0xd8   : > { %v550_v31 = vpop.f32.mrf.mxu1 }
  0xd9   : > { %v551_v32 = vadd.f32 %v550_v31, %v436_v30 }
  0xdb   : > { %v584_v34 = vadd.f32 %v1086_v47, %v551_v32 }
  0xdd   : > { %v600_v35 = vmax.f32 %v584_v34, 0.0 }
  0xde   : > { %v439_v36 = vpop.f32.mrf.mxu0 }
  0xdf   : > { %870 = vmatmul.msk.f32.gmra.mxu2 %vm619_vm2, %v600_v35 }
  0xe0   : > { %v553_v37 = vpop.f32.mrf.mxu1 }
  0xe1   : > { %v554_v38 = vadd.f32 %v553_v37, %v439_v36 }
  0xe3   : > { %v585_v39 = vadd.f32 %v1086_v47, %v554_v38 }
  0xe5   : > { %v601_v41 = vmax.f32 %v585_v39, 0.0 }
  0xe6   : > { %v442_v42 = vpop.f32.mrf.mxu0 }
  0xe7   : > { %871 = vmatmul.msk.f32.gmra.mxu2 %vm619_vm2, %v601_v41 }
  0xe8   : > { %v556_v43 = vpop.f32.mrf.mxu1 }
  0xe9   : > { %v557_v44 = vadd.f32 %v556_v43, %v442_v42 }
  0xeb   : > { %v586_v45 = vadd.f32 %v1086_v47, %v557_v44 }
  0xed   : > { %v602_v46 = vmax.f32 %v586_v45, 0.0 }
  0xee   : > { %v445_v49 = vpop.f32.mrf.mxu0 }
  0xef   : > { %872 = vmatmul.msk.f32.gmra.mxu2 %vm619_vm2, %v602_v46 }
  0xf0   : > { %v559_v50 = vpop.f32.mrf.mxu1 }
  0xf1   : > { %v560_v51 = vadd.f32 %v559_v50, %v445_v49 }
  0xf3   : > { %v587_v52 = vadd.f32 %v1086_v47, %v560_v51 }
  0xf5   : > { %v603_v54 = vmax.f32 %v587_v52, 0.0 }
  0xf7   : > { %873 = vmatmul.msk.f32.vlgmr.msra.gmra.mxu3 %vm619_vm2, %v603_v54 }
  0xff   : > { %874 = vmatmul.msk.f32.gmra.mxu3 %vm619_vm2, %v604_v57 }
 0x107   : > { %875 = vmatmul.msk.f32.gmra.mxu3 %vm619_vm2, %v605_v61 }
 0x10f   : > { %876 = vmatmul.msk.f32.gmra.mxu3 %vm619_vm2, %v606_v0 }
 0x11a   : > { %v685_v2 = vpop.f32.mrf.mxu2 }
 0x11b   : > { %v686_v47 = vadd.f32 %v903_v1, %v685_v2 }
 0x11d   : > { %734 = vst.msk [vmem:[%s1127_s27] sm:$0xff] %vm733_vm3, %v686_v47 }
 0x122   : > { %v688_v3 = vpop.f32.mrf.mxu2 }
 0x123   : > { %v689_v4 = vadd.f32 %v903_v1, %v688_v3 }
 0x125   : > { %735 = vst.msk [vmem:[%s1127_s27 + $0x8] sm:$0xff] %vm733_vm3, %v689_v4 }
 0x12a   : > { %v691_v5 = vpop.f32.mrf.mxu2 }
 0x12b   : > { %v692_v6 = vadd.f32 %v903_v1, %v691_v5 }
 0x12d   : > { %736 = vst.msk [vmem:[%s1127_s27 + $0x10] sm:$0xff] %vm733_vm3, %v692_v6 }
 0x132   : > { %v694_v7 = vpop.f32.mrf.mxu2 }
 0x133   : > { %v695_v8 = vadd.f32 %v903_v1, %v694_v7 }
 0x135   : > { %737 = vst.msk [vmem:[%s1127_s27 + $0x18] sm:$0xff] %vm733_vm3, %v695_v8 }
 0x13a   : > { %v697_v9 = vpop.f32.mrf.mxu2 }
 0x13b   : > { %v698_v10 = vadd.f32 %v903_v1, %v697_v9 }
 0x13d   : > { %738 = vst.msk [vmem:[%s1127_s27 + $0x20] sm:$0xff] %vm733_vm3, %v698_v10 }
 0x142   : > { %v700_v11 = vpop.f32.mrf.mxu2 }
 0x143   : > { %v701_v12 = vadd.f32 %v903_v1, %v700_v11 }
 0x145   : > { %739 = vst.msk [vmem:[%s1127_s27 + $0x28] sm:$0xff] %vm733_vm3, %v701_v12 }
 0x14a   : > { %v703_v13 = vpop.f32.mrf.mxu2 }
 0x14b   : > { %v704_v14 = vadd.f32 %v903_v1, %v703_v13 }
 0x14d   : > { %740 = vst.msk [vmem:[%s1127_s27 + $0x30] sm:$0xff] %vm733_vm3, %v704_v14 }
 0x152   : > { %v706_v15 = vpop.f32.mrf.mxu2 }
 0x153   : > { %v707_v16 = vadd.f32 %v903_v1, %v706_v15 }
 0x155   : > { %741 = vst.msk [vmem:[%s1127_s27 + $0x38] sm:$0xff] %vm733_vm3, %v707_v16 }
 0x15a   : > { %v709_v17 = vpop.f32.mrf.mxu2 }
 0x15b   : > { %v710_v18 = vadd.f32 %v903_v1, %v709_v17 }
 0x15d   : > { %742 = vst.msk [vmem:[%s1127_s27 + $0x40] sm:$0xff] %vm733_vm3, %v710_v18 }
 0x162   : > { %v712_v19 = vpop.f32.mrf.mxu2 }
 0x163   : > { %v713_v20 = vadd.f32 %v903_v1, %v712_v19 }
 0x165   : > { %743 = vst.msk [vmem:[%s1127_s27 + $0x48] sm:$0xff] %vm733_vm3, %v713_v20 }
 0x16a   : > { %v715_v21 = vpop.f32.mrf.mxu2 }
 0x16b   : > { %v716_v22 = vadd.f32 %v903_v1, %v715_v21 }
 0x16d   : > { %744 = vst.msk [vmem:[%s1127_s27 + $0x50] sm:$0xff] %vm733_vm3, %v716_v22 }
 0x172   : > { %v718_v23 = vpop.f32.mrf.mxu2 }
 0x173   : > { %v719_v24 = vadd.f32 %v903_v1, %v718_v23 }
 0x175   : > { %745 = vst.msk [vmem:[%s1127_s27 + $0x58] sm:$0xff] %vm733_vm3, %v719_v24 }
 0x17a   : > { %v721_v25 = vpop.f32.mrf.mxu3 }
 0x17b   : > { %v722_v26 = vadd.f32 %v903_v1, %v721_v25 }
 0x17d   : > { %746 = vst.msk [vmem:[%s1127_s27 + $0x60] sm:$0xff] %vm733_vm3, %v722_v26 }
 0x182   : > { %v724_v27 = vpop.f32.mrf.mxu3 }
 0x183   : > { %v725_v28 = vadd.f32 %v903_v1, %v724_v27 }
 0x185   : > { %747 = vst.msk [vmem:[%s1127_s27 + $0x68] sm:$0xff] %vm733_vm3, %v725_v28 }
 0x18a   : > { %v727_v29 = vpop.f32.mrf.mxu3 }
 0x18b   : > { %v728_v30 = vadd.f32 %v903_v1, %v727_v29 }
 0x18d   : > { %748 = vst.msk [vmem:[%s1127_s27 + $0x70] sm:$0xff] %vm733_vm3, %v728_v30 }
 0x192   : > { %v730_v31 = vpop.f32.mrf.mxu3 }
 0x193   : > { %v731_v32 = vadd.f32 %v903_v1, %v730_v31 }
 0x195   : > { %749 = vst.msk [vmem:[%s1127_s27 + $0x78] sm:$0xff] %vm733_vm3, %v731_v32 }
 0x196 PF: > { %s17_s24 = sadd.s32 1, %s910_s24  }
 0x197   : > { %p14_p4 = scmp.ge.s32.totalorder %s17_s24, 6  }
 0x199   :  { %16 = sbr.rel (!%p14_p4) target bundleno = 1 (0x1), region = 81 }

</bundles_post_ra>
